<compile_context>
chip_gen: v7x
topology: tpu7x:2x2x1
jax: 0.10.0
libtpu: 0.0.40
codegen_flags: <defaults>
</compile_context>

<pallas_src>
import functools

import jax
import jax.numpy as jnp
from jax import lax
from jax.experimental import pallas as pl
from jax.experimental.pallas import tpu as pltpu

NUM_EXPERTS = 4
HIDDEN = 128           # internal projection width fixed by the module
COMBINED = 2 * HIDDEN  # 256


# ---------------------------------------------------------------------------
# Kernel
# ---------------------------------------------------------------------------
def _router_kernel(ft_ref, hw_ref, cw_ref, invt_ref, out_ref):
    """One batch tile of the router forward (all lane-dense, expert axis on sublanes).

    ft_ref   : (tb, Fd+Td)       f32 VMEM  [feature | text] rows
    hw_ref   : (Fd+Td, 256)      f32 VMEM  block-diag sampled hidden weight
    cw_ref   : (E, 256)          f32 VMEM  sampled combined weight, transposed
    invt_ref : (1,)              f32 SMEM  1 / clip(temperature * annealing, 0.5, 5)
    out_ref  : (2, E, tb)        f32 VMEM  out[0] = probs^T, out[1] = logits^T
    """
    num_e = cw_ref.shape[0]

    # Hidden projection: one MXU matmul, (tb, Fd+Td) x (Fd+Td, 256) -> (tb, 256).
    hidden = jnp.dot(ft_ref[...], hw_ref[...], preferred_element_type=jnp.float32)

    # logits^T (E, tb): contract the 256 axis of both operands (no in-kernel transpose).
    dn = (((1,), (1,)), ((), ()))
    logits_t = lax.dot_general(cw_ref[...], hidden, dn,
                               preferred_element_type=jnp.float32)        # (E, tb)

    # Temperature scaling (precomputed reciprocal) + clamp.  The clamp also keeps
    # garbage rows of a ragged final batch block finite before exp().
    logits_t = jnp.clip(logits_t * invt_ref[0], -20.0, 20.0)

    # Softmax over experts, unrolled over the E (sublane) axis as elementwise
    # max/add on full-width (1, tb) rows, then clamp + renormalize (as in the module).
    rows = [logits_t[i:i + 1, :] for i in range(num_e)]
    m = rows[0]
    for r in rows[1:]:
        m = jnp.maximum(m, r)
    e = jnp.exp(logits_t - m)                                              # (E, tb)
    erows = [e[i:i + 1, :] for i in range(num_e)]
    s = erows[0]
    for r in erows[1:]:
        s = s + r
    probs_t = jnp.clip(e / s, 1e-6, 1.0)
    prows = [probs_t[i:i + 1, :] for i in range(num_e)]
    s2 = prows[0]
    for r in prows[1:]:
        s2 = s2 + r
    probs_t = probs_t / s2

    # Single merged, lane-dense output buffer -> one unmasked output store.
    out_ref[0] = probs_t
    out_ref[1] = logits_t
    # TODO(synk): eval-mode (not training) top-1 one-hot branch and the module's
    # conditional NaN/Inf debug prints / nan_to_num input guards are not implemented.


# ---------------------------------------------------------------------------
# Wrapper-side weight sampling (reparameterization fully hoisted; bitwise identical
# to the PyTorch reparameterize()) and block-diagonal packing.
# ---------------------------------------------------------------------------
def _reparam(mu, rho, eps):
    mu = jnp.clip(mu, -10.0, 10.0)
    rho = jnp.clip(rho, -8.0, 4.0)
    sigma = jnp.clip(jnp.log1p(jnp.exp(rho)), 1e-6, 10.0)
    eps = jnp.clip(eps, -2.0, 2.0)
    return mu + sigma * eps


def _sample_and_pack_weights(params, epsilons):
    fw = _reparam(params["feature_mu"], params["feature_rho"], epsilons["epsilon_f"])
    tw = _reparam(params["text_mu"], params["text_rho"], epsilons["epsilon_t"])
    cw = _reparam(params["combined_mu"], params["combined_rho"], epsilons["epsilon_c"])

    fd = fw.shape[0]
    td = tw.shape[0]
    # Block-diagonal hidden weight: [fw 0; 0 tw] -> (Fd+Td, 256) so that
    # [feature | text] @ hw == [feature@fw | text@tw] (the module's concat).
    hw = jnp.concatenate(
        [
            jnp.concatenate([fw, jnp.zeros((fd, HIDDEN), fw.dtype)], axis=1),
            jnp.concatenate([jnp.zeros((td, HIDDEN), tw.dtype), tw], axis=1),
        ],
        axis=0,
    )
    # Combined weight kept transposed (E, 256): lane-dense layout for the in-kernel
    # contraction over the 256 axis.
    return hw.astype(jnp.float32), cw.T.astype(jnp.float32)


def _choose_batch_tile(batch, block_b):
    """Pick the batch tile.  Single block for small B; otherwise 128-aligned tiles
    (lane-dense output block), preferring an even grid for v7x's two TensorCores."""
    if batch <= block_b:
        return batch
    tb = max(128, (block_b // 128) * 128)
    nb = -(-batch // tb)
    if nb > 1 and nb % 2 == 1:
        tb_even = ((-(-batch // (nb + 1)) + 127) // 128) * 128
        if tb_even >= 128 and (-(-batch // tb_even)) % 2 == 0:
            tb = tb_even
    return tb


# ---------------------------------------------------------------------------
# Forward wrapper
# ---------------------------------------------------------------------------
@functools.partial(jax.jit, static_argnames=("block_b",))
def bayesian_router_forward(feature, text_embedding, params, epsilons,
                            annealing_factor=1.0, *, block_b=1024):
    """Training-mode (sampling=True) forward of BayesianRouter -> (probs, logits)."""
    B, fd = feature.shape
    td = text_embedding.shape[1]
    E = params["combined_mu"].shape[1]

    hw, cw = _sample_and_pack_weights(params, epsilons)
    inv_temp = 1.0 / jnp.clip(
        params["temperature"].astype(jnp.float32) * annealing_factor, 0.5, 5.0
    )                                                          # (1,)

    # One concatenated, B-scaled input stream: (B, Fd+Td).
    ft = jnp.concatenate(
        [feature.astype(jnp.float32), text_embedding.astype(jnp.float32)], axis=1
    )

    tb = _choose_batch_tile(B, block_b)
    n_blocks = pl.cdiv(B, tb)   # ragged final block handled by Pallas (no jnp.pad)

    # VMEM guard (mainly for v5e's 16 MiB scoped default at large tiles / wide inputs).
    step_vmem = 4 * (2 * tb * (fd + td) + 2 * 2 * E * tb
                     + 2 * ((fd + td) + E) * COMBINED)
    vmem_limit = None
    if step_vmem > 12 * 1024 * 1024:
        vmem_limit = min(2 * step_vmem, 100 * 1024 * 1024)

    vmem = pltpu.MemorySpace.VMEM
    out = pl.pallas_call(
        _router_kernel,
        out_shape=jax.ShapeDtypeStruct((2, E, B), jnp.float32),
        grid=(n_blocks,),
        in_specs=[
            pl.BlockSpec((tb, fd + td), lambda i: (i, 0), memory_space=vmem),
            pl.BlockSpec((fd + td, COMBINED), lambda i: (0, 0), memory_space=vmem),
            pl.BlockSpec((E, COMBINED), lambda i: (0, 0), memory_space=vmem),
            pl.BlockSpec(memory_space=pltpu.MemorySpace.SMEM),
        ],
        out_specs=pl.BlockSpec((2, E, tb), lambda i: (0, 0, i), memory_space=vmem),
        compiler_params=pltpu.CompilerParams(
            dimension_semantics=("parallel",),
            vmem_limit_bytes=vmem_limit,
        ),
    )(ft, hw, cw, inv_temp)

    probs = out[0].T    # (B, E)
    logits = out[1].T   # (B, E)
    return probs, logits


# ---------------------------------------------------------------------------
# Pure-JAX reference (mirrors the PyTorch module exactly) for correctness checks.
# ---------------------------------------------------------------------------
def _reference_forward(feature, text_embedding, params, epsilons, annealing_factor=1.0):
    fw = _reparam(params["feature_mu"], params["feature_rho"], epsilons["epsilon_f"])
    tw = _reparam(params["text_mu"], params["text_rho"], epsilons["epsilon_t"])
    cw = _reparam(params["combined_mu"], params["combined_rho"], epsilons["epsilon_c"])
    fp = feature @ fw
    tp = text_embedding @ tw
    combined = jnp.concatenate([fp, tp], axis=1)
    logits = combined @ cw
    eff_temp = jnp.clip(params["temperature"][0] * annealing_factor, 0.5, 5.0)
    logits = jnp.clip(logits / eff_temp, -20.0, 20.0)
    probs = jax.nn.softmax(logits, axis=1)
    probs = jnp.clip(probs, 1e-6, 1.0)
    probs = probs / jnp.sum(probs, axis=1, keepdims=True)
    return probs, logits


if __name__ == "__main__":
    key = jax.random.PRNGKey(0)
    FEATURE_DIM, TEXT_DIM = 32, 32
    keys = jax.random.split(key, 10)

    params = {
        "feature_mu": 0.01 * jax.random.normal(keys[0], (FEATURE_DIM, HIDDEN), jnp.float32),
        "feature_rho": jnp.full((FEATURE_DIM, HIDDEN), -4.0, jnp.float32),
        "text_mu": 0.01 * jax.random.normal(keys[1], (TEXT_DIM, HIDDEN), jnp.float32),
        "text_rho": jnp.full((TEXT_DIM, HIDDEN), -4.0, jnp.float32),
        "combined_mu": 0.01 * jax.random.normal(keys[2], (COMBINED, NUM_EXPERTS), jnp.float32),
        "combined_rho": jnp.full((COMBINED, NUM_EXPERTS), -4.0, jnp.float32),
        "temperature": jnp.full((1,), 4.0, jnp.float32),
    }
    epsilons = {
        "epsilon_f": jax.random.normal(keys[3], (FEATURE_DIM, HIDDEN), jnp.float32),
        "epsilon_t": jax.random.normal(keys[4], (TEXT_DIM, HIDDEN), jnp.float32),
        "epsilon_c": jax.random.normal(keys[5], (COMBINED, NUM_EXPERTS), jnp.float32),
    }

    # --- small batch: single grid step, whole-array blocks ---
    B = 4
    feature = jax.random.normal(keys[6], (B, FEATURE_DIM), jnp.float32)
    text_embedding = jax.random.normal(keys[7], (B, TEXT_DIM), jnp.float32)
    probs, logits = bayesian_router_forward(feature, text_embedding, params, epsilons, 1.0)
    jax.block_until_ready((probs, logits))

    rp, rl = _reference_forward(feature, text_embedding, params, epsilons, 1.0)
    assert probs.shape == (B, NUM_EXPERTS) and logits.shape == (B, NUM_EXPERTS)
    assert jnp.allclose(probs, rp, atol=1e-5, rtol=1e-5)
    assert jnp.allclose(logits, rl, atol=1e-5, rtol=1e-5)
    assert jnp.allclose(jnp.sum(probs, axis=1), 1.0, atol=1e-5)

    # --- larger batch: exercises the tiled (even) grid and the ragged final block ---
    B2 = 2500
    feature2 = jax.random.normal(keys[8], (B2, FEATURE_DIM), jnp.float32)
    text2 = jax.random.normal(keys[9], (B2, TEXT_DIM), jnp.float32)
    probs2, logits2 = bayesian_router_forward(feature2, text2, params, epsilons, 0.7,
                                              block_b=1024)
    jax.block_until_ready((probs2, logits2))

    rp2, rl2 = _reference_forward(feature2, text2, params, epsilons, 0.7)
    assert jnp.allclose(probs2, rp2, atol=1e-5, rtol=1e-5)
    assert jnp.allclose(logits2, rl2, atol=1e-5, rtol=1e-5)
    assert jnp.allclose(jnp.sum(probs2, axis=1), 1.0, atol=1e-5)

    print("KERNEL_OK")
</pallas_src>

<mosaic_0001>
module attributes {stable_mosaic.version = 11 : i64} {
  func.func @_router_kernel(%arg0: i32, %arg1: memref<4x64xf32, #tpu.memory_space<vmem>>, %arg2: memref<64x256xf32, #tpu.memory_space<vmem>>, %arg3: memref<4x256xf32, #tpu.memory_space<vmem>>, %arg4: memref<1xf32, #tpu.memory_space<smem>>, %arg5: memref<2x4x4xf32, #tpu.memory_space<vmem>>) attributes {dimension_semantics = [#tpu.dimension_semantics<parallel>], iteration_bounds = array<i64: 1>, scalar_prefetch = 0 : i64, scratch_operands = 0 : i64, tpu.core_type = #tpu.core_type<tc>, window_params = [{transform_indices = @transform_0, window_bounds = array<i64: 4, 64>}, {pipeline_mode = #tpu.pipeline_mode<synchronous>, transform_indices = @transform_1, window_bounds = array<i64: 64, 256>}, {pipeline_mode = #tpu.pipeline_mode<synchronous>, transform_indices = @transform_2, window_bounds = array<i64: 4, 256>}, {transform_indices = @transform_3, window_bounds = array<i64: 1>}, {transform_indices = @transform_4, window_bounds = array<i64: 2, 4, 4>}]} {
    %c0 = arith.constant 0 : index
    %c0_0 = arith.constant 0 : index
    %0 = vector.load %arg1[%c0, %c0_0] : memref<4x64xf32, #tpu.memory_space<vmem>>, vector<4x64xf32>
    %c0_1 = arith.constant 0 : index
    %c0_2 = arith.constant 0 : index
    %1 = vector.load %arg2[%c0_1, %c0_2] : memref<64x256xf32, #tpu.memory_space<vmem>>, vector<64x256xf32>
    %cst = arith.constant dense<0.000000e+00> : vector<4x256xf32>
    %2 = tpu.matmul %0, %1, %cst {dimension_numbers = #tpu.dot_dimension_numbers<[1], [0], [0], [1], [0, 0, 1, 1], [], []>} : vector<4x64xf32>, vector<64x256xf32>, vector<4x256xf32> -> vector<4x256xf32>
    %c0_3 = arith.constant 0 : index
    %c0_4 = arith.constant 0 : index
    %3 = vector.load %arg3[%c0_3, %c0_4] : memref<4x256xf32, #tpu.memory_space<vmem>>, vector<4x256xf32>
    %cst_5 = arith.constant dense<0.000000e+00> : vector<4x4xf32>
    %4 = tpu.matmul %3, %2, %cst_5 {dimension_numbers = #tpu.dot_dimension_numbers<[1], [1], [0], [0], [0, 0, 1, 0], [], []>} : vector<4x256xf32>, vector<4x256xf32>, vector<4x4xf32> -> vector<4x4xf32>
    %c0_6 = arith.constant 0 : index
    %5 = memref.load %arg4[%c0_6] : memref<1xf32, #tpu.memory_space<smem>>
    %6 = vector.broadcast %5 : f32 to vector<4x4xf32>
    %7 = arith.mulf %4, %6 : vector<4x4xf32>
    %cst_7 = arith.constant -2.000000e+01 : f32
    %cst_8 = arith.constant 2.000000e+01 : f32
    %8 = vector.broadcast %cst_7 : f32 to vector<4x4xf32>
    %9 = arith.maximumf %8, %7 : vector<4x4xf32>
    %10 = vector.broadcast %cst_8 : f32 to vector<4x4xf32>
    %11 = arith.minimumf %10, %9 : vector<4x4xf32>
    %12 = vector.extract_strided_slice %11 {offsets = [0, 0], sizes = [1, 4], strides = [1, 1]} : vector<4x4xf32> to vector<1x4xf32>
    %13 = vector.extract_strided_slice %11 {offsets = [1, 0], sizes = [1, 4], strides = [1, 1]} : vector<4x4xf32> to vector<1x4xf32>
    %14 = vector.extract_strided_slice %11 {offsets = [2, 0], sizes = [1, 4], strides = [1, 1]} : vector<4x4xf32> to vector<1x4xf32>
    %15 = vector.extract_strided_slice %11 {offsets = [3, 0], sizes = [1, 4], strides = [1, 1]} : vector<4x4xf32> to vector<1x4xf32>
    %16 = arith.maximumf %12, %13 : vector<1x4xf32>
    %17 = arith.maximumf %16, %14 : vector<1x4xf32>
    %18 = arith.maximumf %17, %15 : vector<1x4xf32>
    %19 = vector.broadcast %18 : vector<1x4xf32> to vector<4x4xf32>
    %20 = arith.subf %11, %19 : vector<4x4xf32>
    %21 = math.exp %20 : vector<4x4xf32>
    %22 = vector.extract_strided_slice %21 {offsets = [0, 0], sizes = [1, 4], strides = [1, 1]} : vector<4x4xf32> to vector<1x4xf32>
    %23 = vector.extract_strided_slice %21 {offsets = [1, 0], sizes = [1, 4], strides = [1, 1]} : vector<4x4xf32> to vector<1x4xf32>
    %24 = vector.extract_strided_slice %21 {offsets = [2, 0], sizes = [1, 4], strides = [1, 1]} : vector<4x4xf32> to vector<1x4xf32>
    %25 = vector.extract_strided_slice %21 {offsets = [3, 0], sizes = [1, 4], strides = [1, 1]} : vector<4x4xf32> to vector<1x4xf32>
    %26 = arith.addf %22, %23 : vector<1x4xf32>
    %27 = arith.addf %26, %24 : vector<1x4xf32>
    %28 = arith.addf %27, %25 : vector<1x4xf32>
    %29 = vector.broadcast %28 : vector<1x4xf32> to vector<4x4xf32>
    %30 = arith.divf %21, %29 : vector<4x4xf32>
    %cst_9 = arith.constant 9.99999997E-7 : f32
    %cst_10 = arith.constant 1.000000e+00 : f32
    %31 = vector.broadcast %cst_9 : f32 to vector<4x4xf32>
    %32 = arith.maximumf %31, %30 : vector<4x4xf32>
    %33 = vector.broadcast %cst_10 : f32 to vector<4x4xf32>
    %34 = arith.minimumf %33, %32 : vector<4x4xf32>
    %35 = vector.extract_strided_slice %34 {offsets = [0, 0], sizes = [1, 4], strides = [1, 1]} : vector<4x4xf32> to vector<1x4xf32>
    %36 = vector.extract_strided_slice %34 {offsets = [1, 0], sizes = [1, 4], strides = [1, 1]} : vector<4x4xf32> to vector<1x4xf32>
    %37 = vector.extract_strided_slice %34 {offsets = [2, 0], sizes = [1, 4], strides = [1, 1]} : vector<4x4xf32> to vector<1x4xf32>
    %38 = vector.extract_strided_slice %34 {offsets = [3, 0], sizes = [1, 4], strides = [1, 1]} : vector<4x4xf32> to vector<1x4xf32>
    %39 = arith.addf %35, %36 : vector<1x4xf32>
    %40 = arith.addf %39, %37 : vector<1x4xf32>
    %41 = arith.addf %40, %38 : vector<1x4xf32>
    %42 = vector.broadcast %41 : vector<1x4xf32> to vector<4x4xf32>
    %43 = arith.divf %34, %42 : vector<4x4xf32>
    %c0_11 = arith.constant 0 : index
    %c0_12 = arith.constant 0 : index
    %c0_13 = arith.constant 0 : index
    %44 = vector.load %arg5[%c0_11, %c0_12, %c0_13] : memref<2x4x4xf32, #tpu.memory_space<vmem>>, vector<1x4x4xf32>
    %45 = vector.shape_cast %44 : vector<1x4x4xf32> to vector<4x4xf32>
    %46 = vector.shape_cast %43 : vector<4x4xf32> to vector<1x4x4xf32>
    tpu.vector_store %arg5[%c0_11, %c0_12, %c0_13], %46 {strides = array<i32>} : memref<2x4x4xf32, #tpu.memory_space<vmem>>, vector<1x4x4xf32>,
    %c1 = arith.constant 1 : index
    %c0_14 = arith.constant 0 : index
    %c0_15 = arith.constant 0 : index
    %47 = vector.load %arg5[%c1, %c0_14, %c0_15] : memref<2x4x4xf32, #tpu.memory_space<vmem>>, vector<1x4x4xf32>
    %48 = vector.shape_cast %47 : vector<1x4x4xf32> to vector<4x4xf32>
    %49 = vector.shape_cast %11 : vector<4x4xf32> to vector<1x4x4xf32>
    tpu.vector_store %arg5[%c1, %c0_14, %c0_15], %49 {strides = array<i32>} : memref<2x4x4xf32, #tpu.memory_space<vmem>>, vector<1x4x4xf32>,
    return
  }
  func.func @transform_0(%arg0: i32) -> (i32, i32) {
    %c0_i32 = arith.constant 0 : i32
    %c0_i32_0 = arith.constant 0 : i32
    return %arg0, %c0_i32 : i32, i32
  }
  func.func @transform_1(%arg0: i32) -> (i32, i32) {
    %c0_i32 = arith.constant 0 : i32
    %c0_i32_0 = arith.constant 0 : i32
    %c0_i32_1 = arith.constant 0 : i32
    return %c0_i32, %c0_i32_0 : i32, i32
  }
  func.func @transform_2(%arg0: i32) -> (i32, i32) {
    %c0_i32 = arith.constant 0 : i32
    %c0_i32_0 = arith.constant 0 : i32
    %c0_i32_1 = arith.constant 0 : i32
    return %c0_i32, %c0_i32_0 : i32, i32
  }
  func.func @transform_3(%arg0: i32) -> i32 {
    %c0_i32 = arith.constant 0 : i32
    %c0_i32_0 = arith.constant 0 : i32
    return %c0_i32 : i32
  }
  func.func @transform_4(%arg0: i32) -> (i32, i32, i32) {
    %c0_i32 = arith.constant 0 : i32
    %c0_i32_0 = arith.constant 0 : i32
    %c0_i32_1 = arith.constant 0 : i32
    return %c0_i32, %c0_i32_0, %arg0 : i32, i32, i32
  }
}

</mosaic_0001>

<bundles_post_ra>
// kernel: bayesian_router_forward.1
= control target key start
LH: loop header
LB: loop body
LE: loop exit
PB: predicated region body
PF: predicated region fallthrough
CT: control target
= control target key end

     0   :  { %v275_v3 = vmov 0.0   ;;  %vm35_vm0 = vcmask 523264   ;;  %v199_v33 = vlaneseq  ;;  %vm240_vm1 = vcmask 27648   ;;  %s366_s1 = inlined_call_operand.vmem [shape: f32[64,256], index: 1, kind: input, shape index: {}]   ;;  %s367_s0 = inlined_call_operand.vmem [shape: f32[4,64], index: 0, kind: input, shape index: {}]   ;;  %s368_s2 = inlined_call_operand.vmem [shape: f32[4,256], index: 2, kind: input, shape index: {}]   ;;  %s369_s3 = inlined_call_operand.<no memory space> [shape: f32[1], index: 3, kind: input, shape index: {}]   ;;  %s370_s4 = inlined_call_operand.vmem [shape: f32[2,4,4], index: 4, kind: output, shape index: {}]  }
   0x1   :  { %v20_v0 = vld [vmem:[%s366_s1 + $0x8] sm:$0xff]  ;;  %v22_v1 = vld [vmem:[%s366_s1 + $0x18] sm:$0xff]  ;;  %v19_v2 = vld [vmem:[%s366_s1] sm:$0xff]  ;;  %103 = vmatprep.mubr.f32.mxu0 %v275_v3  ;;  %v185_v30 = vstv %s369_s3 }
   0x2   :  { %v251_v4 = vpack.c.bf16 %v22_v1, %v20_v0  ;;  %v21_v5 = vld [vmem:[%s366_s1 + $0x10] sm:$0xff]  ;;  %v24_v6 = vld [vmem:[%s366_s1 + $0x28] sm:$0xff]  ;;  %v26_v7 = vld [vmem:[%s366_s1 + $0x38] sm:$0xff]  ;;  %v200_v37 = vshrl.u32 %v199_v33, 7 }
   0x3   :  { %v253_v8 = vpack.c.bf16 %v21_v5, %v19_v2  ;;  %v255_v9 = vpack.c.bf16 %v26_v7, %v24_v6  ;;  %v23_v10 = vld [vmem:[%s366_s1 + $0x20] sm:$0xff]  ;;  %v25_v11 = vld [vmem:[%s366_s1 + $0x30] sm:$0xff]  ;;  %v28_v12 = vld [vmem:[%s366_s1 + $0x48] sm:$0xff] }
   0x4   :  { %252 = vmatprep.subr.bf16.mxu0 %v251_v4  ;;  %v30_v13 = vld [vmem:[%s366_s1 + $0x58] sm:$0xff]  ;;  %v257_v14 = vpack.c.bf16 %v25_v11, %v23_v10  ;;  %v27_v16 = vld [vmem:[%s366_s1 + $0x40] sm:$0xff]  ;;  %v29_v17 = vld [vmem:[%s366_s1 + $0x50] sm:$0xff]  ;;  %v201_v42 = vsub.s32 0, %v200_v37 }
   0x5   :  { %254 = vmatpush1.bf16.msra.mxu0 %v253_v8  ;;  %v259_v15 = vpack.c.bf16 %v30_v13, %v28_v12  ;;  %v32_v18 = vld [vmem:[%s366_s1 + $0x68] sm:$0xff]  ;;  %v34_v19 = vld [vmem:[%s366_s1 + $0x78] sm:$0xff]  ;;  %v261_v20 = vpack.c.bf16 %v29_v17, %v27_v16  ;;  %v31_v22 = vld [vmem:[%s366_s1 + $0x60] sm:$0xff] }
   0x6   :  { %256 = vmatprep.subr.bf16.mxu0 %v255_v9  ;;  %v263_v21 = vpack.c.bf16 %v34_v19, %v32_v18  ;;  %v33_v23 = vld [vmem:[%s366_s1 + $0x70] sm:$0xff]  ;;  %v18_v25 = vld [vmem:[%s367_s0] sm:$0xf] }
   0x7   :  { %v265_v24 = vpack.c.bf16 %v33_v23, %v31_v22  ;;  %v110_v26 = vld [vmem:[%s368_s2] sm:$0xff] }
   0x8   :  { %v112_v27 = vcombine.high %v110_v26, %v110_v26 }
   0x9   :  { %258 = vmatpush1.bf16.msra.mxu0 %v257_v14 }
   0xa   :  { %260 = vmatprep.subr.bf16.mxu0 %v259_v15  ;;  %178 = vmatprep.mubr.f32.mxu1 %v112_v27 }
   0xd   :  { %262 = vmatpush1.bf16.msra.mxu0 %v261_v20 }
   0xe   :  { %264 = vmatprep.subr.bf16.mxu0 %v263_v21 }
  0x11   :  { %266 = vmatpush1.bf16.msra.mxu0 %v265_v24 }
  0x14   :  { %248 = vmatmul.mubr.msk.f32.vlgmr.msra.gmra.mrb[0].mxu0 %vm35_vm0, %v18_v25 }
  0xe7   :  { %v105_v28 = vpop.f32.mrb[0].mxu0 }
  0xe8   :  { %v107_v29 = vpop.f32.mrb[1].mxu0 }
  0xe9   :  { %114 = vmatprep.subr.mxu1 %v107_v29 }
  0xea   :  { %115 = vmatpush1.xpose.msra.mxu1 %v105_v28 }
  0xed   :  { %179 = vmatmul.mubr.f32.vlgmr.msra.gmra.mrb[0].mxu1 %v110_v26 }
 0x1c0   :  { %v180_v31 = vpop.f32.mrb[0].mxu1 }
 0x1c1   :  { %v186_v32 = vmul.f32 %v185_v30, %v180_v31  ;;  %v182_v34 = vpop.f32.mrb[1].mxu1 }
 0x1c3   :  { %v249_v35 = vclamps-f32 %v186_v32, 20.0 }
 0x1c5   :  { %v190_v36 = vrot.slane %v249_v35, 1  ;;  %250 = vst.msk [vmem:[%s370_s4 + $0x4] sm:$0xf] %vm240_vm1, %v249_v35  ;;  %v193_v39 = vrot.slane %v249_v35, 2  ;;  %v196_v41 = vrot.slane %v249_v35, 3 }
 0x1c7   :  { %v192_v38 = vmax.f32 %v249_v35, %v190_v36 }
 0x1c9   :  { %v195_v40 = vmax.f32 %v192_v38, %v193_v39 }
 0x1cb   :  { %v198_v43 = vmax.f32 %v195_v40, %v196_v41 }
 0x1cd   :  { %v202_v44 = vrot.slane %v198_v43, %v201_v42 }
 0x1cf   :  { %v203_v45 = vsub.f32 %v249_v35, %v202_v44 }
 0x1d1   :  { %v204_v46 = vmul.f32 1.442695, %v203_v45 }
 0x1d3   :  { %269 = vpow2.f32 %v204_v46 }
 0x1dd   :  { %v270_v47 = vpop.eup %269 }
 0x1de   :  { %v207_v48 = vrot.slane %v270_v47, 1  ;;  %v210_v50 = vrot.slane %v270_v47, 2  ;;  %v213_v52 = vrot.slane %v270_v47, 3 }
 0x1e0   :  { %v209_v49 = vadd.f32 %v270_v47, %v207_v48 }
 0x1e2   :  { %v212_v51 = vadd.f32 %v210_v50, %v209_v49 }
 0x1e4   :  { %v215_v53 = vadd.f32 %v213_v52, %v212_v51 }
 0x1e6   :  { %v219_v54 = vrot.slane %v215_v53, %v201_v42 }
 0x1e8   :  { %271 = vrcp.f32 %v219_v54 }
 0x1f2   :  { %v272_v55 = vpop.eup %271 }
 0x1f3   :  { %v221_v56 = vmul.f32 %v272_v55, %v270_v47 }
 0x1f5   :  { %v222_v57 = vmax.f32 %v221_v56, 1e-06 }
 0x1f7   :  { %v223_v58 = vmin.f32 %v222_v57, 1.0 }
 0x1f9   :  { %v225_v59 = vrot.slane %v223_v58, 1  ;;  %v228_v61 = vrot.slane %v223_v58, 2  ;;  %v231_v63 = vrot.slane %v223_v58, 3 }
 0x1fb   :  { %v227_v60 = vadd.f32 %v225_v59, %v223_v58 }
 0x1fd   :  { %v230_v62 = vadd.f32 %v228_v61, %v227_v60 }
 0x1ff   :  { %v233_v0 = vadd.f32 %v231_v63, %v230_v62 }
 0x201   :  { %v237_v1 = vrot.slane %v233_v0, %v201_v42 }
 0x203   :  { %273 = vrcp.f32 %v237_v1 }
 0x20d   :  { %v274_v2 = vpop.eup %273 }
 0x20e   :  { %v239_v3 = vmul.f32 %v274_v2, %v223_v58 }
 0x210   :  { %241 = vst.msk [vmem:[%s370_s4] sm:$0xf] %vm240_vm1, %v239_v3 }

</bundles_post_ra>
